<compile_context>
chip_gen: v7x
topology: tpu7x:2x2x1
jax: 0.10.0
libtpu: 0.0.40
codegen_flags: <defaults>
</compile_context>

<pallas_src>
import jax
import jax.numpy as jnp
from jax.experimental import pallas as pl
from jax.experimental.pallas import tpu as pltpu

_LANES = 128
_MAX_BLOCK_BYTES = 4 * 1024 * 1024   # 4x (double-buffered in+out) = 16 MiB << v7x VMEM


def _lambda_kernel(x_ref, o_ref):
    # (x + 1) * 0.5 is bit-exact to (x + 1) / 2 for floats; runs on the VPU.
    o_ref[...] = (x_ref[...] + 1.0) * 0.5


@jax.jit
def lambda_layer(x):
    """Pallas implementation of LambdaLayer.forward: (x + 1) / 2."""
    orig_shape = x.shape
    n = x.size

    # Empty / ragged sizes: a standalone Pallas launch (plus the padding copy it
    # would need) costs more HBM traffic than the op itself — let XLA handle it.
    if n == 0 or n % _LANES != 0:
        return ((x + 1.0) * 0.5).astype(x.dtype)

    # Lane-dense 2D view of the flat buffer; for a contiguous array this is a
    # metadata-only reshape (no extra HBM pass).
    rows = n // _LANES
    x2d = jnp.ravel(x).reshape(rows, _LANES)

    itemsize = jnp.dtype(x.dtype).itemsize
    sub_align = max(8, 32 // itemsize)           # sublane tiling: 8 f32, 16 bf16, 32 i8

    # Largest block <= ~4 MiB (multiple of sub_align rows).
    max_rows_per_tile = max(
        sub_align,
        (_MAX_BLOCK_BYTES // (_LANES * itemsize)) // sub_align * sub_align,
    )
    # ...but keep >= ~8 grid steps when the array allows it (megacore + pipeline).
    target_rows = -(-pl.cdiv(rows, 8) // sub_align) * sub_align
    rows_per_tile = int(min(max_rows_per_tile, max(sub_align, target_rows)))

    grid = (pl.cdiv(rows, rows_per_tile),)       # ragged final block masked by Pallas

    out2d = pl.pallas_call(
        _lambda_kernel,
        out_shape=jax.ShapeDtypeStruct((rows, _LANES), x.dtype),
        grid=grid,
        in_specs=[pl.BlockSpec((rows_per_tile, _LANES), lambda i: (i, 0))],
        out_specs=pl.BlockSpec((rows_per_tile, _LANES), lambda i: (i, 0)),
        compiler_params=pltpu.CompilerParams(
            dimension_semantics=("parallel",),
            vmem_limit_bytes=48 * 1024 * 1024,   # explicit headroom on v5e's 16 MiB default
        ),
    )(x2d)

    return out2d.reshape(orig_shape)


if __name__ == "__main__":
    key = jax.random.PRNGKey(0)
    # Small NCHW-like input consistent with a conv-pipeline lambda layer.
    x = jax.random.normal(key, (2, 4, 16, 16), dtype=jnp.float32)

    y = jax.block_until_ready(lambda_layer(x))

    y_ref = (x + 1.0) / 2.0
    assert y.shape == x.shape and y.dtype == x.dtype
    assert jnp.allclose(y, y_ref, atol=1e-6, rtol=1e-6)

    print("KERNEL_OK")
</pallas_src>

<mosaic_0001>
module attributes {stable_mosaic.version = 11 : i64} {
  func.func @_lambda_kernel(%arg0: i32, %arg1: memref<8x128xf32, #tpu.memory_space<vmem>>, %arg2: memref<8x128xf32, #tpu.memory_space<vmem>>) attributes {dimension_semantics = [#tpu.dimension_semantics<parallel>], iteration_bounds = array<i64: 2>, scalar_prefetch = 0 : i64, scratch_operands = 0 : i64, tpu.core_type = #tpu.core_type<tc>, window_params = [{transform_indices = @transform_0, window_bounds = array<i64: 8, 128>}, {transform_indices = @transform_1, window_bounds = array<i64: 8, 128>}]} {
    %c0 = arith.constant 0 : index
    %c0_0 = arith.constant 0 : index
    %0 = vector.load %arg1[%c0, %c0_0] : memref<8x128xf32, #tpu.memory_space<vmem>>, vector<8x128xf32>
    %cst = arith.constant 1.000000e+00 : f32
    %1 = vector.broadcast %cst : f32 to vector<8x128xf32>
    %2 = arith.addf %0, %1 : vector<8x128xf32>
    %cst_1 = arith.constant 5.000000e-01 : f32
    %3 = vector.broadcast %cst_1 : f32 to vector<8x128xf32>
    %4 = arith.mulf %2, %3 : vector<8x128xf32>
    %c0_2 = arith.constant 0 : index
    %c0_3 = arith.constant 0 : index
    %5 = vector.load %arg2[%c0_2, %c0_3] : memref<8x128xf32, #tpu.memory_space<vmem>>, vector<8x128xf32>
    tpu.vector_store %arg2[%c0_2, %c0_3], %4 {strides = array<i32>} : memref<8x128xf32, #tpu.memory_space<vmem>>, vector<8x128xf32>,
    return
  }
  func.func @transform_0(%arg0: i32) -> (i32, i32) {
    %c0_i32 = arith.constant 0 : i32
    %c0_i32_0 = arith.constant 0 : i32
    return %arg0, %c0_i32 : i32, i32
  }
  func.func @transform_1(%arg0: i32) -> (i32, i32) {
    %c0_i32 = arith.constant 0 : i32
    %c0_i32_0 = arith.constant 0 : i32
    return %arg0, %c0_i32 : i32, i32
  }
}

</mosaic_0001>

<bundles_post_ra>
// kernel: lambda_layer.1
= control target key start
LH: loop header
LB: loop body
LE: loop exit
PB: predicated region body
PF: predicated region fallthrough
CT: control target
= control target key end

     0   :  { %s190_s6 = smov 0   ;;  %s210_s0 = inlined_call_operand.vmem [shape: f32[16,128], index: 0, kind: input, shape index: {}]   ;;  %s211_s1 = inlined_call_operand.vmem [shape: f32[16,128], index: 1, kind: output, shape index: {}]  }
   0x1 LB: > { %s169_s7 = sadd.s32 4294967295, %s192_s6   ;;  %p173_p0 = scmp.ge.s32.totalorder %s192_s6, 1  ;;  %s192_s6 = sphi %s190_s6, %s11_s6  }
   0x2   : > { %p86_p1 = scmp.lt.s32.totalorder %s192_s6, 3 }
   0x4   : > { %p87_p2 = pnand %p173_p0, %p86_p1 }
   0x5   : > { %p104_p3 = scmp.lt.s32.totalorder (!%p87_p2), %s169_s7, 1 }
   0x6   : > { %90 = sbr.rel (%p87_p2) target bundleno = 22 (0x16), region = 24 }
   0xd   : > { %s213_s7 = smov (!%p104_p3, %s169_s7), 1 }
   0xe   : > { %s174_s8 = sshll.u32 %s213_s7, 3 }
   0xf   : > { %s107_s11 = scalar_lea.vmem %s210_s0, %s174_s8  ;;  %s111_s14 = scalar_lea.vmem %s211_s1, %s174_s8 }
  0x10   : > { %v112_v0 = vld [vmem:[%s107_s11] sm:$0xff] }
  0x11   : > { %v113_v1 = vadd.f32 1.0, %v112_v0 }
  0x13   : > { %v114_v2 = vmul.f32 0.5, %v113_v1 }
  0x15   : > { %115 = vst [vmem:[%s111_s14] sm:$0xff] %v114_v2 }
  0x16 PF: > { %s11_s6 = sadd.s32 1, %s192_s6  }
  0x17   : > { %p8_p4 = scmp.ge.s32.totalorder %s11_s6, 4  }
  0x19   :  { %10 = sbr.rel (!%p8_p4) target bundleno = 1 (0x1), region = 54 }

</bundles_post_ra>
